<compile_context>
chip_gen: v7x
topology: tpu7x:2x2x1
jax: 0.10.0
libtpu: 0.0.40
codegen_flags: <defaults>
</compile_context>

<pallas_src>
import jax
import jax.numpy as jnp
from jax.experimental import pallas as pl
from jax.experimental.pallas import tpu as pltpu

_LANES = 128
_MAX_TILE_ROWS = 16384   # (16384, 128) f32 block = 8 MiB per input per buffer


def _device_config():
    """Return (num_tensorcores, vmem_limit_bytes) for the local TPU generation."""
    kind = ""
    try:
        kind = jax.devices()[0].device_kind.lower()
    except Exception:
        pass
    if "v7" in kind:
        # 2 TensorCores per chip, 64 MiB physical VMEM per TC -> 48 MiB scoped.
        return 2, 48 * 1024 * 1024
    if "v5" in kind or "v6" in kind:
        # Single TensorCore, 128 MiB physical VMEM -> generous 64 MiB scoped.
        return 1, 64 * 1024 * 1024
    # Unknown generation: conservative single-core config.
    return 1, 48 * 1024 * 1024


def _make_kernel(tile_r, acc_rows, rows, tiles_per_core, needs_mask):
    groups = tile_r // acc_rows

    def accumulate(acc_ref, sq):
        if groups == 1:
            acc_ref[...] += sq
        else:
            # (tile_r, 128) -> (groups, acc_rows, 128) splits the sublane dim at a
            # multiple of 8, so the reshape keeps the native (8,128) tiling and the
            # axis-0 sum lowers to plain vreg adds on the VPU.
            acc_ref[...] += jnp.sum(sq.reshape(groups, acc_rows, _LANES), axis=0)

    def kernel(recon_ref, x_ref, out_ref, acc_ref):
        c = pl.program_id(0)   # core / parallel axis
        i = pl.program_id(1)   # reduction axis over row tiles

        @pl.when(i == 0)
        def _init():
            acc_ref[...] = jnp.zeros_like(acc_ref)

        # Steady state: cast in-kernel (hidden under DMA slack), pure elementwise
        # squared difference, small (8,128) f32 accumulator.
        diff = recon_ref[...].astype(jnp.float32) - x_ref[...].astype(jnp.float32)
        sq = diff * diff

        if needs_mask:
            row0 = (c * tiles_per_core + i) * tile_r
            is_edge = row0 + tile_r > rows

            @pl.when(is_edge)
            def _edge_tile():
                # Select (not multiply-by-mask) so unspecified edge-block data and
                # fully-masked phantom tiles cannot propagate NaN/Inf.
                row_ids = row0 + jax.lax.broadcasted_iota(
                    jnp.int32, (tile_r, _LANES), 0)
                accumulate(acc_ref, jnp.where(row_ids < rows, sq, 0.0))

            @pl.when(jnp.logical_not(is_edge))
            def _full_tile():
                accumulate(acc_ref, sq)
        else:
            accumulate(acc_ref, sq)

        @pl.when(i == pl.num_programs(1) - 1)
        def _fin():
            out_ref[...] = jnp.broadcast_to(jnp.sum(acc_ref[...]), (1, _LANES))

    return kernel


def vae_loss(recon_x, x, mu, logvar):
    assert recon_x.shape == x.shape
    ncores_cfg, vmem_limit = _device_config()

    # KL term is O(latent) -- compute it with plain jnp in the wrapper.
    mu32 = mu.astype(jnp.float32)
    lv32 = logvar.astype(jnp.float32)
    kl = -0.5 * jnp.sum(1.0 + lv32 - mu32 * mu32 - jnp.exp(lv32))

    r_flat = recon_x.reshape(-1)
    x_flat = x.reshape(-1)
    n = r_flat.shape[0]
    n_bulk = (n // _LANES) * _LANES
    rows = n_bulk // _LANES

    # Ragged (<128-element) tail of the flattened inputs: tiny jnp reduction in
    # the wrapper instead of padding/copying the whole array.
    if n_bulk != n:
        dt = r_flat[n_bulk:].astype(jnp.float32) - x_flat[n_bulk:].astype(jnp.float32)
        tail = jnp.sum(dt * dt)
        r_flat = r_flat[:n_bulk]   # prefix slice of the 128-aligned bulk
        x_flat = x_flat[:n_bulk]
    else:
        tail = jnp.float32(0.0)

    if rows == 0:
        # Everything fit in the ragged tail (very small inputs).
        return tail + 0.001 * kl

    # Lane-dense (rows, 128) slab in native dtype (zero-copy reshape when the
    # element count is 128-aligned).
    r2 = r_flat.reshape(rows, _LANES)
    x2 = x_flat.reshape(rows, _LANES)

    tile_r = rows if rows <= _MAX_TILE_ROWS else _MAX_TILE_ROWS
    n_tiles = pl.cdiv(rows, tile_r)
    ncores = min(ncores_cfg, n_tiles)
    tiles_per_core = pl.cdiv(n_tiles, ncores)
    # Mask only needed when the (core x tile) coverage overshoots the real rows.
    needs_mask = (ncores * tiles_per_core * tile_r) != rows
    acc_rows = 8 if tile_r % 8 == 0 else tile_r   # tiny-input fallback

    def big_map(c, i):
        # Clamp phantom tail tiles to a valid block; their contribution is masked.
        return (jnp.minimum(c * tiles_per_core + i, n_tiles - 1), 0)

    kernel = _make_kernel(tile_r, acc_rows, rows, tiles_per_core, needs_mask)

    bytes_in = r2.size * r2.dtype.itemsize + x2.size * x2.dtype.itemsize
    cost = pl.CostEstimate(
        flops=3 * n_bulk,
        transcendentals=0,
        bytes_accessed=int(bytes_in + ncores * _LANES * 4),
    )

    partials = pl.pallas_call(
        kernel,
        out_shape=jax.ShapeDtypeStruct((ncores, _LANES), jnp.float32),
        grid=(ncores, tiles_per_core),
        in_specs=[
            pl.BlockSpec((tile_r, _LANES), big_map),   # recon_x bulk
            pl.BlockSpec((tile_r, _LANES), big_map),   # x bulk
        ],
        out_specs=pl.BlockSpec((1, _LANES), lambda c, i: (c, 0)),
        scratch_shapes=[
            pltpu.VMEM((acc_rows, _LANES), jnp.float32),   # per-core MSE accumulator
        ],
        compiler_params=pltpu.CompilerParams(
            dimension_semantics=("parallel", "arbitrary"),
            vmem_limit_bytes=vmem_limit,
        ),
        cost_estimate=cost,
    )(r2, x2)

    return jnp.sum(partials[:, 0]) + tail + 0.001 * kl


def _reference(recon_x, x, mu, logvar):
    recon_loss = jnp.sum((recon_x.astype(jnp.float32) - x.astype(jnp.float32)) ** 2)
    lv = logvar.astype(jnp.float32)
    m = mu.astype(jnp.float32)
    kl_div = -0.5 * jnp.sum(1.0 + lv - m ** 2 - jnp.exp(lv))
    return recon_loss + 0.001 * kl_div


if __name__ == "__main__":
    key = jax.random.PRNGKey(0)
    k1, k2, k3, k4 = jax.random.split(key, 4)

    # Small, lane-aligned case (B, C, H, W) + (B, latent).
    B, C, H, W = 2, 4, 16, 16
    LATENT = 32
    recon_x = jax.random.normal(k1, (B, C, H, W), dtype=jnp.float32)
    x = jax.random.normal(k2, (B, C, H, W), dtype=jnp.float32)
    mu = jax.random.normal(k3, (B, LATENT), dtype=jnp.float32)
    logvar = 0.1 * jax.random.normal(k4, (B, LATENT), dtype=jnp.float32)

    loss = jax.block_until_ready(vae_loss(recon_x, x, mu, logvar))
    ref = _reference(recon_x, x, mu, logvar)
    assert jnp.allclose(loss, ref, rtol=1e-5, atol=1e-4), (loss, ref)

    # Odd-sized case to exercise the ragged-tail (wrapper) path.
    k5, k6, k7, k8 = jax.random.split(jax.random.PRNGKey(1), 4)
    recon2 = jax.random.normal(k5, (2, 3, 7, 13), dtype=jnp.float32)
    x2 = jax.random.normal(k6, (2, 3, 7, 13), dtype=jnp.float32)
    mu2 = jax.random.normal(k7, (2, 20), dtype=jnp.float32)
    lv2 = 0.1 * jax.random.normal(k8, (2, 20), dtype=jnp.float32)
    loss2 = jax.block_until_ready(vae_loss(recon2, x2, mu2, lv2))
    ref2 = _reference(recon2, x2, mu2, lv2)
    assert jnp.allclose(loss2, ref2, rtol=1e-5, atol=1e-4), (loss2, ref2)

    print("KERNEL_OK")
</pallas_src>

<mosaic_0001>
module attributes {stable_mosaic.version = 11 : i64} {
  func.func @kernel(%arg0: i32, %arg1: i32, %arg2: memref<16x128xf32, #tpu.memory_space<vmem>>, %arg3: memref<16x128xf32, #tpu.memory_space<vmem>>, %arg4: memref<1x128xf32, #tpu.memory_space<vmem>>, %arg5: memref<8x128xf32, #tpu.memory_space<vmem>>) attributes {dimension_semantics = [#tpu.dimension_semantics<parallel>, #tpu.dimension_semantics<arbitrary>], iteration_bounds = array<i64: 1, 1>, scalar_prefetch = 0 : i64, scratch_operands = 1 : i64, tpu.core_type = #tpu.core_type<tc>, window_params = [{transform_indices = @transform_0, window_bounds = array<i64: 16, 128>}, {transform_indices = @transform_1, window_bounds = array<i64: 16, 128>}, {transform_indices = @transform_2, window_bounds = array<i64: 1, 128>}]} {
    %c0_i32 = arith.constant 0 : i32
    %0 = arith.cmpi eq, %arg1, %c0_i32 : i32
    %1 = arith.extui %0 : i1 to i32
    %c0_i32_0 = arith.constant 0 : i32
    %2 = arith.cmpi ne, %1, %c0_i32_0 : i32
    scf.if %2 {
      %cst_10 = arith.constant 0.000000e+00 : f32
      %15 = vector.broadcast %cst_10 : f32 to vector<8x128xf32>
      %c0_11 = arith.constant 0 : index
      %c0_12 = arith.constant 0 : index
      %16 = vector.load %arg5[%c0_11, %c0_12] : memref<8x128xf32, #tpu.memory_space<vmem>>, vector<8x128xf32>
      tpu.vector_store %arg5[%c0_11, %c0_12], %15 {strides = array<i32>} : memref<8x128xf32, #tpu.memory_space<vmem>>, vector<8x128xf32>,
    } else {
    }
    %c0 = arith.constant 0 : index
    %c0_1 = arith.constant 0 : index
    %3 = vector.load %arg2[%c0, %c0_1] : memref<16x128xf32, #tpu.memory_space<vmem>>, vector<16x128xf32>
    %c0_2 = arith.constant 0 : index
    %c0_3 = arith.constant 0 : index
    %4 = vector.load %arg3[%c0_2, %c0_3] : memref<16x128xf32, #tpu.memory_space<vmem>>, vector<16x128xf32>
    %5 = arith.subf %3, %4 : vector<16x128xf32>
    %6 = arith.mulf %5, %5 : vector<16x128xf32>
    %c0_4 = arith.constant 0 : index
    %c0_5 = arith.constant 0 : index
    %7 = vector.load %arg5[%c0_4, %c0_5] : memref<8x128xf32, #tpu.memory_space<vmem>>, vector<8x128xf32>
    %8 = vector.shape_cast %6 : vector<16x128xf32> to vector<2x8x128xf32>
    %cst = arith.constant dense<0.000000e+00> : vector<8x128xf32>
    %9 = vector.multi_reduction <add>, %8, %cst [0] : vector<2x8x128xf32> to vector<8x128xf32>
    %10 = arith.addf %7, %9 : vector<8x128xf32>
    %c0_6 = arith.constant 0 : index
    %c0_7 = arith.constant 0 : index
    %11 = vector.load %arg5[%c0_6, %c0_7] : memref<8x128xf32, #tpu.memory_space<vmem>>, vector<8x128xf32>
    tpu.vector_store %arg5[%c0_6, %c0_7], %10 {strides = array<i32>} : memref<8x128xf32, #tpu.memory_space<vmem>>, vector<8x128xf32>,
    %c0_i32_8 = arith.constant 0 : i32
    %12 = arith.cmpi eq, %arg1, %c0_i32_8 : i32
    %13 = arith.extui %12 : i1 to i32
    %c0_i32_9 = arith.constant 0 : i32
    %14 = arith.cmpi ne, %13, %c0_i32_9 : i32
    scf.if %14 {
      %c0_10 = arith.constant 0 : index
      %c0_11 = arith.constant 0 : index
      %15 = vector.load %arg5[%c0_10, %c0_11] : memref<8x128xf32, #tpu.memory_space<vmem>>, vector<8x128xf32>
      %16 = vector.shape_cast %15 : vector<8x128xf32> to vector<1x8x128xf32>
      %cst_12 = arith.constant dense<0.000000e+00> : vector<1xf32>
      %17 = vector.multi_reduction <add>, %16, %cst_12 [1, 2] : vector<1x8x128xf32> to vector<1xf32>
      %18 = vector.shape_cast %17 : vector<1xf32> to vector<1x1x1xf32>
      %19 = vector.extract %18[0, 0, 0] : f32 from vector<1x1x1xf32>
      %20 = vector.broadcast %19 : f32 to vector<1x128xf32>
      %c0_13 = arith.constant 0 : index
      %c0_14 = arith.constant 0 : index
      %21 = vector.load %arg4[%c0_13, %c0_14] : memref<1x128xf32, #tpu.memory_space<vmem>>, vector<1x128xf32>
      tpu.vector_store %arg4[%c0_13, %c0_14], %20 {strides = array<i32>} : memref<1x128xf32, #tpu.memory_space<vmem>>, vector<1x128xf32>,
    } else {
    }
    return
  }
  func.func @transform_0(%arg0: i32, %arg1: i32) -> (i32, i32) {
    %c1_i32 = arith.constant 1 : i32
    %0 = arith.muli %arg0, %c1_i32 : i32
    %1 = arith.addi %0, %arg1 : i32
    %c0_i32 = arith.constant 0 : i32
    %2 = arith.minsi %1, %c0_i32 : i32
    %c0_i32_0 = arith.constant 0 : i32
    %c0_i32_1 = arith.constant 0 : i32
    return %2, %c0_i32_0 : i32, i32
  }
  func.func @transform_1(%arg0: i32, %arg1: i32) -> (i32, i32) {
    %c1_i32 = arith.constant 1 : i32
    %0 = arith.muli %arg0, %c1_i32 : i32
    %1 = arith.addi %0, %arg1 : i32
    %c0_i32 = arith.constant 0 : i32
    %2 = arith.minsi %1, %c0_i32 : i32
    %c0_i32_0 = arith.constant 0 : i32
    %c0_i32_1 = arith.constant 0 : i32
    return %2, %c0_i32_0 : i32, i32
  }
  func.func @transform_2(%arg0: i32, %arg1: i32) -> (i32, i32) {
    %c0_i32 = arith.constant 0 : i32
    %c0_i32_0 = arith.constant 0 : i32
    return %arg0, %c0_i32 : i32, i32
  }
}

</mosaic_0001>

<bundles_post_ra>
// kernel: tpu_custom_call.1
= control target key start
LH: loop header
LB: loop body
LE: loop exit
PB: predicated region body
PF: predicated region fallthrough
CT: control target
= control target key end

     0   :  { %7 = vsyncpa [#allocation4], 0  ;;  %s247_s0 = inlined_call_operand.hbm [shape: f32[16,128], index: 0, kind: input, shape index: {}]   ;;  %s248_s1 = inlined_call_operand.hbm [shape: f32[16,128], index: 1, kind: input, shape index: {}]   ;;  %s249_s2 = inlined_call_operand.hbm [shape: f32[1,128], index: 2, kind: output, shape index: {}]  }
   0x1   :  { %8 = vsyncpa [#allocation7], 0 }
   0x2   :  { %9 = vsyncpa [#allocation5], 0  ;;  %s191_s9 = smov [#allocation3]   ;;  %s119_s13 = scalar_lea.hbm %s247_s0, 256 }
   0x3   :  { %s21_s10 = sshll.u32 %s191_s9, 4  ;;  %p120_p0 = scmp.ne.s32.totalorder %s247_s0, %s119_s13  ;;  %s22_s10 = int_to_ptr.vmem [resolvable:$true] %s21_s10 }
   0x4   :  { %p123_p1 = scmp.lt.u32.totalorder %s119_s13, %s247_s0 }
   0x6   :  { %p125_p2 = pnand %p123_p1, %p120_p0 }
   0x8   :  { %128 = shalt.err (!%p125_p2)
}
   0x9   :  { %s129_s18 = scalar_lea.vmem %s22_s10, 256  ;;  %p134_p4 = scmp.lt.s32.totalorder %s22_s10, %s22_s10 }
   0xa   :  { %p130_p3 = scmp.ne.s32.totalorder %s22_s10, %s129_s18  ;;  %p135_p5 = scmp.lt.s32.totalorder %s129_s18, %s129_s18 }
   0xc   :  { %p136_p6 = por %p135_p5, %p134_p4 }
   0xe   :  { %p137_p7 = pnand %p136_p6, %p130_p3 }
  0x10   :  { %140 = shalt.err (!%p137_p7)
}
  0x11   :  { %s192_s19 = smov 128   ;;  %s193_s20 = smov 8  }
  0x12   :  { %27 = dma.hbm_to_vmem [thread:$0]  %s247_s0, 256, %s22_s10, [#allocation4], %s192_s19, %s192_s19, %s193_s20  }
  0x13   :  { %s194_s23 = smov [#allocation6]   ;;  %s141_s27 = scalar_lea.hbm %s248_s1, 256 }
  0x14   :  { %s39_s24 = sshll.u32 %s194_s23, 4  ;;  %p142_p8 = scmp.ne.s32.totalorder %s248_s1, %s141_s27  ;;  %s40_s24 = int_to_ptr.vmem [resolvable:$true] %s39_s24 }
  0x15   :  { %p145_p9 = scmp.lt.u32.totalorder %s141_s27, %s248_s1 }
  0x17   :  { %p147_p10 = pnand %p145_p9, %p142_p8 }
  0x19   :  { %150 = shalt.err (!%p147_p10)
}
  0x1a   :  { %s151_s4 = scalar_lea.vmem %s40_s24, 256  ;;  %p156_p12 = scmp.lt.s32.totalorder %s40_s24, %s40_s24 }
  0x1b   :  { %p152_p11 = scmp.ne.s32.totalorder %s40_s24, %s151_s4  ;;  %p157_p13 = scmp.lt.s32.totalorder %s151_s4, %s151_s4 }
  0x1d   :  { %p158_p0 = por %p157_p13, %p156_p12 }
  0x1f   :  { %p159_p1 = pnand %p158_p0, %p152_p11 }
  0x21   :  { %162 = shalt.err (!%p159_p1)
}
  0x22   :  { %45 = dma.hbm_to_vmem [thread:$0]  %s248_s1, 256, %s40_s24, [#allocation7], %s192_s19, %s192_s19, %s193_s20  }
  0x23   :  { %185 = dma.done.wait [#allocation4], 256  }
  0x24   :  { %186 = vsyncadd [#allocation4], 4294967040 }
  0x25   :  { %187 = dma.done.wait [#allocation7], 256  }
  0x26   :  { %188 = vsyncadd [#allocation7], 4294967040  ;;  %v65_v0 = vld [vmem:[#allocation3] sm:$0xff]  ;;  %v66_v1 = vld [vmem:[#allocation3 + $0x8] sm:$0xff]  ;;  %s195_s1 = smov [#allocation8]  }
  0x27   :  { %v67_v2 = vld [vmem:[#allocation6] sm:$0xff]  ;;  %v68_v3 = vld [vmem:[#allocation6 + $0x8] sm:$0xff]  ;;  %s98_s6 = sshll.u32 %s195_s1, 4  ;;  %s99_s6 = int_to_ptr.vmem [resolvable:$true] %s98_s6 }
  0x28   :  { %v69_v4 = vsub.f32 %v65_v0, %v67_v2  ;;  %v70_v5 = vsub.f32 %v66_v1, %v68_v3  ;;  %s163_s8 = scalar_lea.vmem %s99_s6, 16  ;;  %s167_s9 = scalar_lea.vmem %s99_s6, 32 }
  0x29   :  { %p164_p2 = scmp.ne.s32.totalorder %s99_s6, %s163_s8  ;;  %p168_p3 = scmp.lt.s32.totalorder %s99_s6, %s99_s6 }
  0x2a   :  { %v71_v6 = vmul.f32 %v69_v4, %v69_v4  ;;  %v72_v7 = vmul.f32 %v70_v5, %v70_v5  ;;  %p169_p4 = scmp.lt.s32.totalorder %s167_s9, %s163_s8 }
  0x2c   :  { %v74_v8 = vadd.f32 %v72_v7, %v71_v6  ;;  %p170_p5 = por %p169_p4, %p168_p3 }
  0x2e   :  { %81 = vadd.xlane.f32.xlu0 %v74_v8  ;;  %p171_p6 = pnand %p170_p5, %p164_p2 }
  0xbb   :  { %v82_v9 = vpop.xlane.xlu0 %81 }
  0xbc   :  { %v83_v10 = vrot.slane %v82_v9, 4 }
  0xbe   :  { %v84_v11 = vadd.f32 %v83_v10, %v82_v9 }
  0xc0   :  { %v85_v12 = vrot.slane %v84_v11, 2 }
  0xc2   :  { %v86_v13 = vadd.f32 %v85_v12, %v84_v11 }
  0xc4   :  { %v87_v14 = vrot.slane %v86_v13, 1 }
  0xc6   :  { %v88_v15 = vadd.f32 %v87_v14, %v86_v13 }
  0xc8   :  { %112 = vpush %v88_v15 }
  0xf9   :  { %s113_s7 = spop %112 }
  0xfa   :  { %v90_v16 = vstv %s113_s7 }
  0xfb   :  { %91 = vst [vmem:[#allocation8] sm:$0x1] %v90_v16 }
  0xfc   :  { %174 = shalt.err (!%p171_p6)
}
  0xfd   :  { %s175_s12 = scalar_lea.hbm %s249_s2, 16 }
  0xfe   :  { %p176_p7 = scmp.ne.s32.totalorder %s249_s2, %s175_s12  ;;  %p179_p8 = scmp.lt.u32.totalorder %s175_s12, %s249_s2 }
 0x100   :  { %p181_p9 = pnand %p179_p8, %p176_p7 }
 0x102   :  { %184 = shalt.err (!%p181_p9)
}
 0x103   :  { %101 = dma.vmem_to_hbm [thread:$0]  %s99_s6, 16, %s249_s2, [#allocation5]  }
 0x104   :  { %189 = dma.done.wait [#allocation5], 16  }
 0x105   :  { %190 = vsyncadd [#allocation5], 4294967280 }
 0x106   :  { %105 = vsyncpa [#allocation4], 1 }
 0x107   :  { %106 = vsyncpa [#allocation7], 1 }
 0x108   :  { %107 = vsyncpa [#allocation5], 1 }

</bundles_post_ra>
